<compile_context>
chip_gen: v7x
topology: tpu7x:2x2x1
jax: 0.10.0
libtpu: 0.0.40
codegen_flags: <defaults>
</compile_context>

<pallas_src>
import functools

import jax
import jax.numpy as jnp
from jax import lax
from jax.experimental import pallas as pl
from jax.experimental.pallas import tpu as pltpu


# ----------------------------- planning helpers -----------------------------

def _round_up(x, m):
    return (x + m - 1) // m * m


def _vmem_bytes(shape, dtype):
    """Conservative VMEM footprint of one array, with (8,128) tile padding."""
    shape = [int(s) for s in shape]
    if len(shape) >= 1:
        shape[-1] = _round_up(shape[-1], 128)
    if len(shape) >= 2:
        shape[-2] = _round_up(shape[-2], 8)
    n = 1
    for s in shape:
        n *= s
    return n * jnp.dtype(dtype).itemsize


def _aligned_divisors(n, align=8):
    return [d for d in range(align, n + 1, align) if n % d == 0]


def _vmem_capacity_bytes():
    try:
        return int(pltpu.get_tpu_info().vmem_capacity_bytes)
    except Exception:
        return 64 * 1024 * 1024          # conservative fallback (v7x-sized)


def _vmem_limit_bytes():
    cap = _vmem_capacity_bytes()
    # ~3/4 of physical VMEM (~96 MiB on v5e/v6e, ~48 MiB on v7x); leaves headroom
    # for compiler-internal scratch and pipeline machinery.
    return min(cap * 3 // 4, cap - 8 * 1024 * 1024)


# ----------------------------- linear (x @ W^T + b) -----------------------------

def _linear_kernel(x_ref, w_ref, b_ref, o_ref):
    # nn.Linear: y = x @ W^T + b with W: (out, in).  Contract the "in" dims directly
    # (no w.T).  Compute in f32 (inputs may be bf16 activations with f32 weights).
    y = lax.dot_general(x_ref[...].astype(jnp.float32), w_ref[...].astype(jnp.float32),
                        (((1,), (1,)), ((), ())), preferred_element_type=jnp.float32)
    o_ref[...] = (y + b_ref[...].astype(jnp.float32)).astype(o_ref.dtype)


def pallas_linear(x2d, w, b2d, *, out_dtype=None, block_m=512, vmem_limit=None):
    """x2d: (M, in), w: (out, in), b2d: (1, out) -> (M, out) in out_dtype."""
    M, in_dim = x2d.shape
    out_dim = w.shape[0]
    out_dtype = jnp.dtype(out_dtype or x2d.dtype)
    if vmem_limit is None:
        vmem_limit = _vmem_limit_bytes()
    budget = int(vmem_limit * 0.85)

    fixed = (2 * _vmem_bytes((out_dim, in_dim), w.dtype)
             + 2 * _vmem_bytes((1, out_dim), b2d.dtype))

    def total(tm):
        return (fixed
                + 2 * _vmem_bytes((tm, in_dim), x2d.dtype)
                + 2 * _vmem_bytes((tm, out_dim), out_dtype)
                + _vmem_bytes((tm, out_dim), jnp.float32))   # f32 intermediate

    # Largest aligned divisor of M that fits the budget (never one giant block unless
    # M itself is the only legal tiling, i.e. M % 8 != 0).
    cands = sorted([d for d in _aligned_divisors(M) if d <= block_m] or [M], reverse=True)
    tm = next((t for t in cands if total(t) <= budget), cands[-1])
    # TODO(synk): for very large (out_dim, in_dim) weights an additional N/K tiling of
    # the weight would be needed; not required at these model sizes.

    return pl.pallas_call(
        _linear_kernel,
        out_shape=jax.ShapeDtypeStruct((M, out_dim), out_dtype),
        grid=(M // tm,),
        in_specs=[
            pl.BlockSpec((tm, in_dim), lambda i: (i, 0)),
            pl.BlockSpec((out_dim, in_dim), lambda i: (0, 0)),
            pl.BlockSpec((1, out_dim), lambda i: (0, 0)),
        ],
        out_specs=pl.BlockSpec((tm, out_dim), lambda i: (i, 0)),
        compiler_params=pltpu.CompilerParams(
            dimension_semantics=("parallel",),
            vmem_limit_bytes=int(vmem_limit)),
    )(x2d, w, b2d)


# ------------------ fused relative attention (+ fused r projection) ------------------

def _rel_attn_kernel(q_ref, k_ref, v_ref, r_ref, wr_ref, br_ref, rb_ref, o_ref,
                     m_ref, l_ref, acc_ref, cb_ref, wqb_ref,
                     *, num_heads, scale, approx_recip):
    kt = pl.program_id(2)
    _, tq, E = q_ref.shape
    _, tk, _ = k_ref.shape
    h = num_heads
    dk = E // h
    f32 = jnp.float32

    @pl.when(kt == 0)
    def _init():
        # Online-softmax state reset + per-(batch, Q-tile) precompute (K-independent):
        #   wqb[q,h,e] = sum_d (q + r_bias)[q, h*dk+d] * W_r[h*dk+d, e]
        #   cb[h,q]    = sum_d (q + r_bias)[q, h*dk+d] * b_r[h*dk+d]
        m_ref[...] = jnp.full(m_ref.shape, -jnp.inf, f32)
        l_ref[...] = jnp.zeros(l_ref.shape, f32)
        acc_ref[...] = jnp.zeros(acc_ref.shape, f32)
        qb = q_ref[0].astype(f32) + rb_ref[...].astype(f32)               # (tq, E)
        qb_h = jnp.transpose(qb.reshape(tq, h, dk), (1, 0, 2))            # (h, tq, dk)
        wr_h = wr_ref[...].astype(f32).reshape(h, dk, E)                  # (h, dk, E)
        wqb = lax.dot_general(qb_h, wr_h, (((2,), (1,)), ((0,), (0,))),
                              preferred_element_type=f32)                 # (h, tq, E)
        wqb_ref[...] = jnp.transpose(wqb, (1, 0, 2)).astype(wqb_ref.dtype)  # (tq, h, E)
        br_h = br_ref[...].astype(f32).reshape(h, 1, dk)                  # (h, 1, dk)
        cb_ref[...] = jnp.sum(qb_h * br_h, axis=-1, keepdims=True)        # (h, tq, 1)

    # Relative term: contract the *raw* bf16 r tile with W_r^T(q + r_bias) on the MXU.
    # Batching over query rows means the natural output layout is (tq, h, tk); the
    # single (tq,h)->(h,tq) flip below is the only remaining per-tile relayout and is
    # hidden under the r DMA (kernel is HBM-bound on r).
    rel = lax.dot_general(wqb_ref[...], r_ref[0], (((2,), (2,)), ((0,), (0,))),
                          preferred_element_type=f32)                     # (tq, h, tk)
    rel_t = jnp.transpose(rel, (1, 0, 2))                                 # (h, tq, tk)

    # Per-head flash-style update.  Heads are read via static lane slices of the
    # lane-dense (L, E) tiles — no reshape/transpose relayouts of q/k/v per K tile.
    for hh in range(h):
        lo = hh * dk
        q_hh = q_ref[0, :, lo:lo + dk]                                    # (tq, dk) bf16
        k_hh = k_ref[0, :, lo:lo + dk]                                    # (tk, dk) bf16
        v_hh = v_ref[0, :, lo:lo + dk]                                    # (tk, dk) bf16

        s = lax.dot_general(q_hh, k_hh, (((1,), (1,)), ((), ())),
                            preferred_element_type=f32)                   # (tq, tk)
        s = (s + rel_t[hh] + cb_ref[hh]) * scale
        # TODO(synk): mask support omitted (forward is exercised with mask=None);
        # masked tiles would need the usual all--inf guard here.

        m_prev = m_ref[hh]                                                # (tq, 1)
        m_new = jnp.maximum(m_prev, jnp.max(s, axis=-1, keepdims=True))
        alpha = jnp.exp(m_prev - m_new)
        p = jnp.exp(s - m_new)                                            # (tq, tk) f32
        l_ref[hh] = alpha * l_ref[hh] + jnp.sum(p, axis=-1, keepdims=True)
        acc_ref[hh] = alpha * acc_ref[hh] + lax.dot_general(
            p.astype(v_ref.dtype), v_hh, (((1,), (0,)), ((), ())),
            preferred_element_type=f32)                                   # (tq, dk)
        m_ref[hh] = m_new
        # dropout on p is identity in inference mode.

    @pl.when(kt == pl.num_programs(2) - 1)
    def _finalize():
        out = acc_ref[...] * pl.reciprocal(l_ref[...], approx=approx_recip)  # (h, tq, dk)
        o_ref[0] = jnp.transpose(out, (1, 0, 2)).reshape(tq, E).astype(o_ref.dtype)


def _plan_attention(Q, K, E, num_heads, compute_dtype, *, q_cap=256, k_cap=4096):
    """Pick (Q tile, K tile, vmem_limit) so that *all* VMEM consumers fit the
    per-generation budget (r/k/v/q/out double buffers, W_r, scratches, temporaries)."""
    dk = E // num_heads
    f32 = jnp.float32
    vmem_limit = _vmem_limit_bytes()
    budget = int(vmem_limit * 0.85)

    def total(tq, tk):
        t = 0
        t += 2 * _vmem_bytes((tq, tk, E), compute_dtype)          # r tile (double buffered)
        t += 2 * 2 * _vmem_bytes((tk, E), compute_dtype)          # k, v tiles
        t += 2 * 2 * _vmem_bytes((tq, E), compute_dtype)          # resident q + output block
        t += 2 * _vmem_bytes((E, E), f32)                         # W_r
        t += 4 * _vmem_bytes((1, E), f32)                         # b_r, r_bias
        t += 3 * _vmem_bytes((num_heads, tq, 1), f32)             # m, l, cb scratch
        t += _vmem_bytes((num_heads, tq, dk), f32)                # acc scratch
        t += _vmem_bytes((tq, num_heads, E), compute_dtype)       # wqb scratch
        # in-kernel f32 temporaries: max(init-time wqb relayout, per-tile rel + flip + p)
        t += max(2 * _vmem_bytes((num_heads, tq, E), f32),
                 2 * _vmem_bytes((tq, num_heads, tk), f32) + _vmem_bytes((tq, tk), f32))
        return t

    tq_cands = sorted([d for d in _aligned_divisors(Q) if d <= q_cap] or [Q], reverse=True)
    tk_cands = sorted([d for d in _aligned_divisors(K) if d <= k_cap] or [K], reverse=True)

    best = None
    for tq in tq_cands:
        for tk in tk_cands:
            if total(tq, tk) <= budget:
                if best is None or (tk, tq) > (best[1], best[0]):
                    best = (tq, tk)       # prefer the fattest K tile (streamed axis)
                break
    if best is None:
        best = (tq_cands[-1], tk_cands[-1])   # smallest legal tiles; compiler will
                                              # error loudly if even these don't fit.
    return best[0], best[1], vmem_limit


def pallas_rel_attention(q, k, v, r, wr, br, rb_flat, *, num_heads, scale,
                         block_q=None, block_k=None):
    """q: (B,Q,E), k/v: (B,K,E), r (raw, un-projected): (B,Q,K,E),
    wr: (E,E), br/rb_flat: (1,E).  All of q/k/v/r share one compute dtype."""
    B, Q, E = q.shape
    K = k.shape[1]
    dk = E // num_heads
    cd = q.dtype

    tq, tk, vmem_limit = _plan_attention(Q, K, E, num_heads, cd)
    if block_q is not None:
        tq = block_q
    if block_k is not None:
        tk = block_k
    num_qt, num_kt = Q // tq, K // tk
    approx = jnp.dtype(cd) != jnp.dtype(jnp.float32)

    kern = functools.partial(_rel_attn_kernel, num_heads=num_heads, scale=scale,
                             approx_recip=approx)
    cost = pl.CostEstimate(
        flops=int(2 * B * Q * K * E * (num_heads + 2) + 2 * B * Q * E * E),
        transcendentals=int(2 * B * num_heads * Q * K),
        bytes_accessed=int((B * Q * K * E + 2 * B * K * E + 2 * B * Q * E)
                           * jnp.dtype(cd).itemsize + (E * E + 2 * E) * 4),
    )

    # NOTE: the K (reduction) axis must remain the innermost grid axis — the
    # init/finalize pattern and scratch persistence rely on it.
    # TODO(synk): optionally sweep pipeline depth on the r BlockSpec
    # (pipeline_mode=pl.Buffered(3)) once block_k is finalized on real shapes.
    return pl.pallas_call(
        kern,
        out_shape=jax.ShapeDtypeStruct((B, Q, E), cd),
        grid=(B, num_qt, num_kt),
        in_specs=[
            pl.BlockSpec((1, tq, E), lambda b, qi, kt: (b, qi, 0)),            # q (resident over kt)
            pl.BlockSpec((1, tk, E), lambda b, qi, kt: (b, kt, 0)),            # k tile
            pl.BlockSpec((1, tk, E), lambda b, qi, kt: (b, kt, 0)),            # v tile
            pl.BlockSpec((1, tq, tk, E), lambda b, qi, kt: (b, qi, kt, 0)),    # raw r tile
            pl.BlockSpec((E, E), lambda b, qi, kt: (0, 0)),                    # W_r
            pl.BlockSpec((1, E), lambda b, qi, kt: (0, 0)),                    # b_r
            pl.BlockSpec((1, E), lambda b, qi, kt: (0, 0)),                    # r_bias (flat)
        ],
        out_specs=pl.BlockSpec((1, tq, E), lambda b, qi, kt: (b, qi, 0)),
        scratch_shapes=[
            pltpu.VMEM((num_heads, tq, 1), jnp.float32),     # running max
            pltpu.VMEM((num_heads, tq, 1), jnp.float32),     # running denom
            pltpu.VMEM((num_heads, tq, dk), jnp.float32),    # running numerator
            pltpu.VMEM((num_heads, tq, 1), jnp.float32),     # (q + r_bias) . b_r
            pltpu.VMEM((tq, num_heads, E), cd),              # W_r^T (q + r_bias)
        ],
        compiler_params=pltpu.CompilerParams(
            dimension_semantics=("parallel", "parallel", "arbitrary"),
            vmem_limit_bytes=int(vmem_limit)),
        cost_estimate=cost,
    )(q, k, v, r, wr, br, rb_flat)


# ----------------------------- module wrapper -----------------------------

def init_params(key, embed_dim, num_heads):
    d_k = embed_dim // num_heads
    ks = jax.random.split(key, 11)

    def lin(kw, kb, out_dim, in_dim):
        bound = 1.0 / (in_dim ** 0.5)
        w = jax.random.uniform(kw, (out_dim, in_dim), jnp.float32, -bound, bound)
        b = jax.random.uniform(kb, (1, out_dim), jnp.float32, -bound, bound)
        return w, b

    wq, bq = lin(ks[0], ks[1], embed_dim, embed_dim)
    wk, bk = lin(ks[2], ks[3], embed_dim, embed_dim)
    wv, bv = lin(ks[4], ks[5], embed_dim, embed_dim)
    wr, br = lin(ks[6], ks[7], embed_dim, embed_dim)
    wo, bo = lin(ks[8], ks[9], embed_dim, embed_dim)
    r_bias = jax.random.uniform(ks[10], (1, num_heads, 1, d_k), jnp.float32)
    return dict(wq=wq, bq=bq, wk=wk, bk=bk, wv=wv, bv=bv,
                wr=wr, br=br, wo=wo, bo=bo, r_bias=r_bias,
                num_heads=num_heads, embed_dim=embed_dim)


def relative_attention_forward(params, query, key, value, r, *,
                               compute_dtype=jnp.bfloat16,
                               block_q=None, block_k=None):
    B, Q, E = query.shape
    h = params["num_heads"]
    assert E % h == 0
    d_k = E // h
    scale = 1.0 / (d_k ** 0.5)
    cd = jnp.dtype(compute_dtype)
    vmem_limit = _vmem_limit_bytes()

    def run_linear(x, w, b, out_dtype):
        y = pallas_linear(x.reshape(-1, x.shape[-1]), w, b,
                          out_dtype=out_dtype, vmem_limit=vmem_limit)
        return y.reshape(x.shape[:-1] + (w.shape[0],))

    # Projections (emit the streaming compute dtype directly — no extra cast pass).
    if query is key and key is value:
        # Self-attention: fuse q/k/v into one (3E, E) GEMM so x is read once.
        w_qkv = jnp.concatenate([params["wq"], params["wk"], params["wv"]], axis=0)
        b_qkv = jnp.concatenate([params["bq"], params["bk"], params["bv"]], axis=1)
        qkv = run_linear(query, w_qkv, b_qkv, cd)                 # (B, Q, 3E)
        q, k, v = jnp.split(qkv, 3, axis=-1)
    else:
        q = run_linear(query, params["wq"], params["bq"], cd)
        if key is value:
            w_kv = jnp.concatenate([params["wk"], params["wv"]], axis=0)
            b_kv = jnp.concatenate([params["bk"], params["bv"]], axis=1)
            kv = run_linear(key, w_kv, b_kv, cd)
            k, v = jnp.split(kv, 2, axis=-1)
        else:
            k = run_linear(key, params["wk"], params["bk"], cd)
            v = run_linear(value, params["wv"], params["bv"], cd)

    # The r projection is fused (and algebraically reordered) into the attention
    # kernel; only the *raw* r is ever streamed, in the compute dtype.
    # TODO(synk): ideally r is produced/stored in bf16 upstream so this cast is free.
    r_c = r.astype(cd)
    rb_flat = params["r_bias"].reshape(1, E).astype(jnp.float32)

    ctx = pallas_rel_attention(q, k, v, r_c, params["wr"], params["br"], rb_flat,
                               num_heads=h, scale=scale,
                               block_q=block_q, block_k=block_k)   # (B, Q, E) in cd
    return run_linear(ctx, params["wo"], params["bo"], query.dtype)


# ------------------------------ pure-JAX ref ------------------------------

def reference_forward(params, query, key, value, r, *, compute_dtype=jnp.float32):
    """Faithful (non-reordered) formulation.  compute_dtype emulates the storage /
    streaming dtype of the attention-core inputs so the comparison isolates the
    kernel's own numerics; math stays f32."""
    B, Q, E = query.shape
    K = key.shape[1]
    h = params["num_heads"]
    d_k = E // h
    scale = 1.0 / (d_k ** 0.5)
    cd = jnp.dtype(compute_dtype)

    def lin(x, w, b):
        return x @ w.T + b[0]

    def stream(x):
        return x.astype(cd).astype(jnp.float32)

    q = stream(lin(query, params["wq"], params["bq"])).reshape(B, Q, h, d_k).transpose(0, 2, 1, 3)
    k = stream(lin(key, params["wk"], params["bk"])).reshape(B, K, h, d_k).transpose(0, 2, 1, 3)
    v = stream(lin(value, params["wv"], params["bv"])).reshape(B, K, h, d_k).transpose(0, 2, 1, 3)
    rp = lin(stream(r), params["wr"], params["br"]).reshape(B, Q, K, h, d_k).transpose(0, 3, 1, 2, 4)

    scores = jnp.einsum("bhqd,bhkd->bhqk", q, k)
    scores = scores + jnp.einsum("bhqd,bhqkd->bhqk", q + params["r_bias"], rp)
    scores = scores * scale
    p = jax.nn.softmax(scores, axis=-1)
    x = jnp.einsum("bhqk,bhkd->bhqd", p, v)
    x = x.transpose(0, 2, 1, 3).reshape(B, Q, E)
    return lin(x, params["wo"], params["bo"])


# ---------------------------------- main ----------------------------------

if __name__ == "__main__":
    B, T, E, H = 2, 8, 32, 4   # temporal self-attention: Q = K = T, d_k = 8
    root = jax.random.PRNGKey(0)
    kp, kx, kr = jax.random.split(root, 3)

    params = init_params(kp, E, H)
    x = jax.random.normal(kx, (B, T, E), jnp.float32)
    r = jax.random.normal(kr, (B, T, T, E), jnp.float32)

    # bf16 streaming policy (default): compare against a reference that applies the
    # same storage dtype to the attention-core inputs but does plain f32 math.
    out = relative_attention_forward(params, x, x, x, r)
    out = jax.block_until_ready(out)
    assert out.shape == (B, T, E)
    ref_bf16 = reference_forward(params, x, x, x, r, compute_dtype=jnp.bfloat16)
    err_bf16 = float(jnp.max(jnp.abs(out - ref_bf16)))
    assert jnp.allclose(out, ref_bf16, atol=2e-2, rtol=2e-2), err_bf16

    # f32 policy: tight check of the fused / reordered algebra.
    out32 = relative_attention_forward(params, x, x, x, r, compute_dtype=jnp.float32)
    out32 = jax.block_until_ready(out32)
    ref32 = reference_forward(params, x, x, x, r, compute_dtype=jnp.float32)
    err32 = float(jnp.max(jnp.abs(out32 - ref32)))
    assert jnp.allclose(out32, ref32, atol=2e-3, rtol=2e-3), err32

    print("KERNEL_OK")
</pallas_src>

<mosaic_0001>
module attributes {stable_mosaic.version = 11 : i64} {
  func.func @_linear_kernel(%arg0: i32, %arg1: memref<16x32xf32, #tpu.memory_space<vmem>>, %arg2: memref<96x32xf32, #tpu.memory_space<vmem>>, %arg3: memref<1x96xf32, #tpu.memory_space<vmem>>, %arg4: memref<16x96xbf16, #tpu.memory_space<vmem>>) attributes {dimension_semantics = [#tpu.dimension_semantics<parallel>], iteration_bounds = array<i64: 1>, scalar_prefetch = 0 : i64, scratch_operands = 0 : i64, tpu.core_type = #tpu.core_type<tc>, window_params = [{transform_indices = @transform_0, window_bounds = array<i64: 16, 32>}, {pipeline_mode = #tpu.pipeline_mode<synchronous>, transform_indices = @transform_1, window_bounds = array<i64: 96, 32>}, {pipeline_mode = #tpu.pipeline_mode<synchronous>, transform_indices = @transform_2, window_bounds = array<i64: 1, 96>}, {transform_indices = @transform_3, window_bounds = array<i64: 16, 96>}]} {
    %c0 = arith.constant 0 : index
    %c0_0 = arith.constant 0 : index
    %0 = vector.load %arg1[%c0, %c0_0] : memref<16x32xf32, #tpu.memory_space<vmem>>, vector<16x32xf32>
    %c0_1 = arith.constant 0 : index
    %c0_2 = arith.constant 0 : index
    %1 = vector.load %arg2[%c0_1, %c0_2] : memref<96x32xf32, #tpu.memory_space<vmem>>, vector<96x32xf32>
    %cst = arith.constant dense<0.000000e+00> : vector<16x96xf32>
    %2 = tpu.matmul %0, %1, %cst {dimension_numbers = #tpu.dot_dimension_numbers<[1], [1], [0], [0], [0, 0, 1, 0], [], []>} : vector<16x32xf32>, vector<96x32xf32>, vector<16x96xf32> -> vector<16x96xf32>
    %c0_3 = arith.constant 0 : index
    %c0_4 = arith.constant 0 : index
    %3 = vector.load %arg3[%c0_3, %c0_4] : memref<1x96xf32, #tpu.memory_space<vmem>>, vector<1x96xf32>
    %4 = vector.broadcast %3 : vector<1x96xf32> to vector<16x96xf32>
    %5 = arith.addf %2, %4 : vector<16x96xf32>
    %6 = arith.truncf %5 : vector<16x96xf32> to vector<16x96xbf16>
    %c0_5 = arith.constant 0 : index
    %c0_6 = arith.constant 0 : index
    %7 = vector.load %arg4[%c0_5, %c0_6] : memref<16x96xbf16, #tpu.memory_space<vmem>>, vector<16x96xbf16>
    tpu.vector_store %arg4[%c0_5, %c0_6], %6 {strides = array<i32>} : memref<16x96xbf16, #tpu.memory_space<vmem>>, vector<16x96xbf16>,
    return
  }
  func.func @transform_0(%arg0: i32) -> (i32, i32) {
    %c0_i32 = arith.constant 0 : i32
    %c0_i32_0 = arith.constant 0 : i32
    return %arg0, %c0_i32 : i32, i32
  }
  func.func @transform_1(%arg0: i32) -> (i32, i32) {
    %c0_i32 = arith.constant 0 : i32
    %c0_i32_0 = arith.constant 0 : i32
    %c0_i32_1 = arith.constant 0 : i32
    return %c0_i32, %c0_i32_0 : i32, i32
  }
  func.func @transform_2(%arg0: i32) -> (i32, i32) {
    %c0_i32 = arith.constant 0 : i32
    %c0_i32_0 = arith.constant 0 : i32
    %c0_i32_1 = arith.constant 0 : i32
    return %c0_i32, %c0_i32_0 : i32, i32
  }
  func.func @transform_3(%arg0: i32) -> (i32, i32) {
    %c0_i32 = arith.constant 0 : i32
    %c0_i32_0 = arith.constant 0 : i32
    return %arg0, %c0_i32 : i32, i32
  }
}

</mosaic_0001>

<bundles_post_ra>
// kernel: tpu_custom_call.1
= control target key start
LH: loop header
LB: loop body
LE: loop exit
PB: predicated region body
PF: predicated region fallthrough
CT: control target
= control target key end

     0   :  { %vm36_vm0 = vcmask 261120   ;;  %s416_s0 = inlined_call_operand.vmem [shape: f32[16,32], index: 0, kind: input, shape index: {}]   ;;  %s417_s1 = inlined_call_operand.vmem [shape: f32[96,32], index: 1, kind: input, shape index: {}]   ;;  %s418_s2 = inlined_call_operand.vmem [shape: f32[1,96], index: 2, kind: input, shape index: {}]   ;;  %s419_s3 = inlined_call_operand.hbm [shape: bf16[16,96], index: 3, kind: output, shape index: {}]  }
   0x1   :  { %v17_v0 = vld [vmem:[%s417_s1] sm:$0xff]  ;;  %v18_v1 = vld [vmem:[%s417_s1 + $0x8] sm:$0xff]  ;;  %v19_v2 = vld [vmem:[%s417_s1 + $0x10] sm:$0xff] }
   0x2   :  { %v241_v3 = vpack.c.bf16 %v18_v1, %v17_v0  ;;  %vm338_vm1 = vmpackc.low %vm36_vm0, %vm36_vm0  ;;  %v20_v5 = vld [vmem:[%s417_s1 + $0x18] sm:$0xff]  ;;  %v15_v7 = vld [vmem:[%s416_s0] sm:$0xff] }
   0x3   :  { %v247_v6 = vpack.c.bf16 %v20_v5, %v19_v2  ;;  %238 = vmatprep.mubr.msk.f32.mxu0 %vm36_vm0, %v15_v7 }
   0x4   :  { %243 = vmatprep.subr.msk.bf16.mxu0 %vm338_vm1, %v241_v3 }
   0x5   :  { %246 = vmatpush3.bf16.xpose.msk.msra.mxu0 %vm338_vm1, %v241_v3 }
   0x6   :  { %249 = vmatprep.subr.msk.bf16.mxu0 %vm338_vm1, %v247_v6 }
   0x7   :  { %8 = vsyncpa [#allocation3], 0  ;;  %v21_v8 = vld [vmem:[%s417_s1 + $0x20] sm:$0xff]  ;;  %v22_v9 = vld [vmem:[%s417_s1 + $0x28] sm:$0xff]  ;;  %vm162_vm2 = vcmask 781312  }
   0x8   :  { %v253_v10 = vpack.c.bf16 %v22_v9, %v21_v8  ;;  %v23_v11 = vld [vmem:[%s417_s1 + $0x30] sm:$0xff]  ;;  %v24_v12 = vld [vmem:[%s417_s1 + $0x38] sm:$0xff]  ;;  %v25_v14 = vld [vmem:[%s417_s1 + $0x40] sm:$0xff] }
   0x9   :  { %v259_v13 = vpack.c.bf16 %v24_v12, %v23_v11  ;;  %v26_v15 = vld [vmem:[%s417_s1 + $0x48] sm:$0xff]  ;;  %v27_v17 = vld [vmem:[%s417_s1 + $0x50] sm:$0xff]  ;;  %v28_v18 = vld [vmem:[%s417_s1 + $0x58] sm:$0xff]  ;;  %s304_s1 = smov [#allocation2]  }
   0xa   :  { %v265_v16 = vpack.c.bf16 %v26_v15, %v25_v14  ;;  %v271_v19 = vpack.c.bf16 %v28_v18, %v27_v17  ;;  %v16_v20 = vld [vmem:[%s416_s0 + $0x8] sm:$0xff]  ;;  %v181_v21 = vld [vmem:[%s418_s2] ss:$0 sm:$0xff]  ;;  %s170_s15 = sshll.u32 %s304_s1, 4  ;;  %s171_s15 = int_to_ptr.vmem [resolvable:$true] %s170_s15 }
   0xb   :  { %s280_s16 = scalar_lea.vmem %s171_s15, 128  ;;  %p285_p1 = scmp.lt.s32.totalorder %s171_s15, %s171_s15 }
   0xc   :  { %p281_p0 = scmp.ne.s32.totalorder %s171_s15, %s280_s16  ;;  %p286_p2 = scmp.lt.s32.totalorder %s280_s16, %s280_s16 }
   0xd   :  { %252 = vmatpush3.bf16.xpose.msk.msra.mxu0 %vm338_vm1, %v247_v6 }
   0xe   :  { %255 = vmatprep.subr.msk.bf16.mxu0 %vm338_vm1, %v253_v10  ;;  %p287_p3 = por %p286_p2, %p285_p1 }
  0x10   :  { %p288_p4 = pnand %p287_p3, %p281_p0 }
  0x15   :  { %258 = vmatpush3.bf16.xpose.msk.msra.mxu0 %vm338_vm1, %v253_v10 }
  0x16   :  { %261 = vmatprep.subr.msk.bf16.mxu0 %vm338_vm1, %v259_v13 }
  0x1d   :  { %264 = vmatpush3.bf16.xpose.msk.msra.mxu0 %vm338_vm1, %v259_v13 }
  0x1e   :  { %267 = vmatprep.subr.msk.bf16.mxu0 %vm338_vm1, %v265_v16 }
  0x25   :  { %270 = vmatpush3.bf16.xpose.msk.msra.mxu0 %vm338_vm1, %v265_v16 }
  0x26   :  { %273 = vmatprep.subr.msk.bf16.mxu0 %vm338_vm1, %v271_v19 }
  0x2d   :  { %276 = vmatpush3.bf16.xpose.msk.msra.mxu0 %vm338_vm1, %v271_v19 }
  0x34   :  { %239 = vmatmul.mubr.msk.f32.vlgmr.msra.gmra.mrb[0].mxu0 %vm36_vm0, %v16_v20 }
 0x107   :  { %v240_v22 = vpop.f32.mrb[0].mxu0 }
 0x108   :  { %v151_v23 = vadd.f32 %v240_v22, %v181_v21  ;;  %v145_v24 = vpop.f32.mrb[1].mxu0 }
 0x109   :  { %v146_v25 = vadd.f32 %v181_v21, %v145_v24 }
 0x10a   :  { %v199_v26 = vpack.c.bf16 %v151_v23, %v151_v23 }
 0x10b   :  { %v198_v27 = vpack.c.bf16 %v146_v25, %v146_v25 }
 0x10c   :  { %164 = vst.msk [vmem:[#allocation2 + $0x4] sm:$0xf] %vm162_vm2, %v199_v26 }
 0x10d   :  { %163 = vst.msk [vmem:[#allocation2] sm:$0xf] %vm162_vm2, %v198_v27 }
 0x10e   :  { %291 = shalt.err (!%p288_p4)
}
 0x10f   :  { %s292_s17 = scalar_lea.hbm %s419_s3, 128 }
 0x110   :  { %p293_p5 = scmp.ne.s32.totalorder %s419_s3, %s292_s17  ;;  %p296_p6 = scmp.lt.u32.totalorder %s292_s17, %s419_s3 }
 0x112   :  { %p298_p7 = pnand %p296_p6, %p293_p5 }
 0x114   :  { %301 = shalt.err (!%p298_p7)
}
 0x115   :  { %s305_s22 = smov 64   ;;  %s306_s23 = smov 4  }
 0x116   :  { %176 = dma.vmem_to_hbm [thread:$0]  %s171_s15, 128, %s419_s3, [#allocation3], %s305_s22, %s305_s22, %s306_s23  }
 0x117   :  { %302 = dma.done.wait [#allocation3], 128  }
 0x118   :  { %303 = vsyncadd [#allocation3], 4294967168 }
 0x119   :  { %180 = vsyncpa [#allocation3], 1 }

</bundles_post_ra>
